<compile_context>
chip_gen: v7x
topology: tpu7x:2x2x1
jax: 0.10.0
libtpu: 0.0.40
codegen_flags: <defaults>
</compile_context>

<pallas_src>
import functools

import jax
import jax.numpy as jnp
from jax.experimental import pallas as pl
from jax.experimental.pallas import tpu as pltpu  # noqa: F401  (TPU backend)


# ------------------------- fused LSTM + FFN kernel ---------------------------

def _rnn_ffn_kernel(*refs, L, NP, H, n_ffn):
    """refs = (x2, wih_t, whh_t, bias, [w_j, b_j]*n_ffn, out).

    x2:    (L*NP, D)  time-major, batch padded to NP sublanes
    wih_t: (D, 4H)    W_ih^T, gate columns permuted to (i, f, o, g)
    whh_t: (H, 4H)    W_hh^T, same column permutation
    bias:  (1, 4H)    (b_ih + b_hh), same permutation
    out:   (L*NP, F_out)
    """
    x_ref, wih_ref, whh_ref, b_ref = refs[:4]
    ffn_refs = refs[4:4 + 2 * n_ffn]
    out_ref = refs[4 + 2 * n_ffn]

    # ---- hoisted input projection: one MXU matmul for the whole sequence ---
    gates_x = (jnp.dot(x_ref[...], wih_ref[...],
                       preferred_element_type=jnp.float32)
               + b_ref[...])                                   # (L*NP, 4H)

    whh = whh_ref[...]                                         # (H, 4H), VMEM-resident
    # TODO(synk): at realistic H, hold whh in the MXU across the unrolled loop
    # via pltpu.matmul_push_rhs / matmul_acc_lhs / matmul_pop (and on v7x use
    # MRB in-place accumulation of gates_x into the matmul result).

    # ---- recurrence (serial over time, fully unrolled; h/c stay in vregs) --
    h = jnp.zeros((NP, H), jnp.float32)
    c = jnp.zeros((NP, H), jnp.float32)
    hs = []
    for t in range(L):
        gates = gates_x[t * NP:(t + 1) * NP, :] + jnp.dot(
            h, whh, preferred_element_type=jnp.float32)        # (NP, 4H) = one vreg
        # Columns are (i, f, o, g): one sigmoid + one tanh per step.
        sig = jax.nn.sigmoid(gates[:, 0:3 * H])
        g_g = jnp.tanh(gates[:, 3 * H:4 * H])
        i_g = sig[:, 0:H]
        f_g = sig[:, H:2 * H]
        o_g = sig[:, 2 * H:3 * H]
        c = f_g * c + i_g * g_g
        h = o_g * jnp.tanh(c)
        hs.append(h)                                           # value, no VMEM store

    # ---- fused FFN on all hidden states at once (single writeback) ---------
    y = jnp.concatenate(hs, axis=0)                            # (L*NP, H)
    for j in range(n_ffn):
        w = ffn_refs[2 * j][...]
        bb = ffn_refs[2 * j + 1][...]
        y = jnp.dot(y, w, preferred_element_type=jnp.float32) + bb
        if j < n_ffn - 1:                                      # ReLU between layers,
            y = jnp.maximum(y, 0.0)                            # Identity after last
    # TODO(synk): at realistic sizes make the output lane-dense (f_out a
    # multiple of 128, or pack into a (., 128) slab and reshape in XLA).
    out_ref[...] = y.astype(out_ref.dtype)


# --------------------------------- wrapper ------------------------------------

def rnn_forward(params, x):
    """Equivalent of RNN.forward: x (N, L, D) -> (N, L, ffn_sizes[-1])."""
    N, L, D = x.shape
    H = params["w_hh"].shape[1]
    n_ffn = len(params["ffn_w"])
    f_out = params["ffn_w"][-1].shape[1]

    # Pad batch to a sublane multiple so every per-timestep block is (8, 4H).
    NP = max(8, ((N + 7) // 8) * 8)

    # Gate-column permutation: PyTorch row order (i, f, g, o) -> (i, f, o, g),
    # applied consistently to W_ih, W_hh and the combined bias (done once in
    # XLA on tiny weights -- free).
    perm = jnp.concatenate([
        jnp.arange(0 * H, 1 * H), jnp.arange(1 * H, 2 * H),
        jnp.arange(3 * H, 4 * H), jnp.arange(2 * H, 3 * H)])

    # TODO(synk): cast matmul operands to bf16 at realistic N/H (keep h/c math f32).
    wih_t = params["w_ih"][perm, :].T.astype(jnp.float32)            # (D, 4H)
    whh_t = params["w_hh"][perm, :].T.astype(jnp.float32)            # (H, 4H)
    bias = ((params["b_ih"] + params["b_hh"])[perm]
            .reshape(1, 4 * H).astype(jnp.float32))                  # (1, 4H)

    # Time-major, zero-pad batch, flatten so each timestep is a contiguous
    # 8-row (NP, D) block inside the kernel.  Tiny layout plumbing in XLA.
    x_tm = jnp.transpose(x, (1, 0, 2)).astype(jnp.float32)           # (L, N, D)
    x_tm = jnp.pad(x_tm, ((0, 0), (0, NP - N), (0, 0)))              # (L, NP, D)
    x2 = x_tm.reshape(L * NP, D)

    ffn_args = []
    for w, b in zip(params["ffn_w"], params["ffn_b"]):
        ffn_args.append(w.astype(jnp.float32))                       # (K, F)
        ffn_args.append(b.reshape(1, -1).astype(jnp.float32))        # (1, F)

    kernel = functools.partial(_rnn_ffn_kernel, L=L, NP=NP, H=H, n_ffn=n_ffn)
    out2 = pl.pallas_call(
        kernel,
        out_shape=jax.ShapeDtypeStruct((L * NP, f_out), jnp.float32),
    )(x2, wih_t, whh_t, bias, *ffn_args)

    # TODO(synk): for realistic N/L, add a parallel batch grid axis (megacore /
    # v7x 2 TCs) and chunk the time axis ("arbitrary") for 64 MiB VMEM.
    out = out2.reshape(L, NP, f_out)[:, :N, :]                       # strip padding
    return jnp.transpose(out, (1, 0, 2))                             # (N, L, F)


# --------------------------------- reference ---------------------------------

def rnn_reference(params, x):
    w_ih, w_hh = params["w_ih"], params["w_hh"]
    b = params["b_ih"] + params["b_hh"]
    N, L, D = x.shape
    H = w_hh.shape[1]

    def step(carry, x_t):
        h, c = carry
        gates = x_t @ w_ih.T + h @ w_hh.T + b
        i = jax.nn.sigmoid(gates[:, 0:H])
        f = jax.nn.sigmoid(gates[:, H:2 * H])
        g = jnp.tanh(gates[:, 2 * H:3 * H])
        o = jax.nn.sigmoid(gates[:, 3 * H:4 * H])
        c = f * c + i * g
        h = o * jnp.tanh(c)
        return (h, c), h

    init = (jnp.zeros((N, H), jnp.float32), jnp.zeros((N, H), jnp.float32))
    _, hs = jax.lax.scan(step, init, jnp.transpose(x, (1, 0, 2)))
    y = jnp.transpose(hs, (1, 0, 2)).reshape(N * L, H)
    n_layers = len(params["ffn_w"])
    for j, (w, b_) in enumerate(zip(params["ffn_w"], params["ffn_b"])):
        y = y @ w + b_
        if j < n_layers - 1:
            y = jnp.maximum(y, 0.0)
    return y.reshape(N, L, -1)


# ------------------------------------ main ------------------------------------

if __name__ == "__main__":
    N, L, D = 2, 8, 4            # batch, seq len, path dim (rnn_in)
    H = 32                       # rnn_hidden
    ffn_sizes = [H, 16, 8]       # Linear(32->16) + ReLU, Linear(16->8) + Identity

    key = jax.random.PRNGKey(0)
    keys = jax.random.split(key, 16)
    s = 1.0 / jnp.sqrt(jnp.float32(H))

    params = {
        "w_ih": jax.random.uniform(keys[0], (4 * H, D), jnp.float32, -s, s),
        "w_hh": jax.random.uniform(keys[1], (4 * H, H), jnp.float32, -s, s),
        "b_ih": jax.random.uniform(keys[2], (4 * H,), jnp.float32, -s, s),
        "b_hh": jax.random.uniform(keys[3], (4 * H,), jnp.float32, -s, s),
        "ffn_w": [],
        "ffn_b": [],
    }
    for j in range(len(ffn_sizes) - 1):
        fan_in = ffn_sizes[j]
        bound = 1.0 / jnp.sqrt(jnp.float32(fan_in))
        params["ffn_w"].append(jax.random.uniform(
            keys[4 + 2 * j], (ffn_sizes[j], ffn_sizes[j + 1]),
            jnp.float32, -bound, bound))
        params["ffn_b"].append(jax.random.uniform(
            keys[5 + 2 * j], (ffn_sizes[j + 1],), jnp.float32, -bound, bound))

    x = jax.random.normal(keys[10], (N, L, D), jnp.float32)

    out = rnn_forward(params, x)
    out = jax.block_until_ready(out)

    ref = rnn_reference(params, x)
    assert out.shape == (N, L, ffn_sizes[-1]), out.shape
    assert jnp.allclose(out, ref, rtol=1e-3, atol=1e-3), \
        float(jnp.max(jnp.abs(out - ref)))

    print("KERNEL_OK")
</pallas_src>

<mosaic_0001>
module attributes {stable_mosaic.version = 11 : i64} {
  func.func @_rnn_ffn_kernel(%arg0: memref<64x4xf32, #tpu.memory_space<vmem>>, %arg1: memref<4x128xf32, #tpu.memory_space<vmem>>, %arg2: memref<32x128xf32, #tpu.memory_space<vmem>>, %arg3: memref<1x128xf32, #tpu.memory_space<vmem>>, %arg4: memref<32x16xf32, #tpu.memory_space<vmem>>, %arg5: memref<1x16xf32, #tpu.memory_space<vmem>>, %arg6: memref<16x8xf32, #tpu.memory_space<vmem>>, %arg7: memref<1x8xf32, #tpu.memory_space<vmem>>, %arg8: memref<64x8xf32, #tpu.memory_space<vmem>>) attributes {dimension_semantics = [], scalar_prefetch = 0 : i64, scratch_operands = 0 : i64, tpu.core_type = #tpu.core_type<tc>} {
    %c0 = arith.constant 0 : index
    %c0_0 = arith.constant 0 : index
    %0 = vector.load %arg0[%c0, %c0_0] : memref<64x4xf32, #tpu.memory_space<vmem>>, vector<64x4xf32>
    %c0_1 = arith.constant 0 : index
    %c0_2 = arith.constant 0 : index
    %1 = vector.load %arg1[%c0_1, %c0_2] : memref<4x128xf32, #tpu.memory_space<vmem>>, vector<4x128xf32>
    %cst = arith.constant dense<0.000000e+00> : vector<64x128xf32>
    %2 = tpu.matmul %0, %1, %cst {dimension_numbers = #tpu.dot_dimension_numbers<[1], [0], [0], [1], [0, 0, 1, 1], [], []>} : vector<64x4xf32>, vector<4x128xf32>, vector<64x128xf32> -> vector<64x128xf32>
    %c0_3 = arith.constant 0 : index
    %c0_4 = arith.constant 0 : index
    %3 = vector.load %arg3[%c0_3, %c0_4] : memref<1x128xf32, #tpu.memory_space<vmem>>, vector<1x128xf32>
    %4 = vector.broadcast %3 : vector<1x128xf32> to vector<64x128xf32>
    %5 = arith.addf %2, %4 : vector<64x128xf32>
    %c0_5 = arith.constant 0 : index
    %c0_6 = arith.constant 0 : index
    %6 = vector.load %arg2[%c0_5, %c0_6] : memref<32x128xf32, #tpu.memory_space<vmem>>, vector<32x128xf32>
    %cst_7 = arith.constant 0.000000e+00 : f32
    %7 = vector.broadcast %cst_7 : f32 to vector<8x32xf32>
    %cst_8 = arith.constant 0.000000e+00 : f32
    %8 = vector.broadcast %cst_8 : f32 to vector<8x32xf32>
    %9 = vector.extract_strided_slice %5 {offsets = [0, 0], sizes = [8, 128], strides = [1, 1]} : vector<64x128xf32> to vector<8x128xf32>
    %cst_9 = arith.constant dense<0.000000e+00> : vector<8x128xf32>
    %10 = tpu.matmul %7, %6, %cst_9 {dimension_numbers = #tpu.dot_dimension_numbers<[1], [0], [0], [1], [0, 0, 1, 1], [], []>} : vector<8x32xf32>, vector<32x128xf32>, vector<8x128xf32> -> vector<8x128xf32>
    %11 = arith.addf %9, %10 : vector<8x128xf32>
    %12 = vector.extract_strided_slice %11 {offsets = [0, 0], sizes = [8, 96], strides = [1, 1]} : vector<8x128xf32> to vector<8x96xf32>
    %13 = arith.negf %12 : vector<8x96xf32>
    %14 = math.exp %13 : vector<8x96xf32>
    %cst_10 = arith.constant 1.000000e+00 : f32
    %15 = vector.broadcast %cst_10 : f32 to vector<8x96xf32>
    %16 = arith.addf %15, %14 : vector<8x96xf32>
    %17 = arith.divf %15, %16 : vector<8x96xf32>
    %18 = vector.extract_strided_slice %11 {offsets = [0, 96], sizes = [8, 32], strides = [1, 1]} : vector<8x128xf32> to vector<8x32xf32>
    %19 = math.tanh %18 : vector<8x32xf32>
    %20 = vector.extract_strided_slice %17 {offsets = [0, 0], sizes = [8, 32], strides = [1, 1]} : vector<8x96xf32> to vector<8x32xf32>
    %21 = vector.extract_strided_slice %17 {offsets = [0, 32], sizes = [8, 32], strides = [1, 1]} : vector<8x96xf32> to vector<8x32xf32>
    %22 = vector.extract_strided_slice %17 {offsets = [0, 64], sizes = [8, 32], strides = [1, 1]} : vector<8x96xf32> to vector<8x32xf32>
    %23 = arith.mulf %21, %8 : vector<8x32xf32>
    %24 = arith.mulf %20, %19 : vector<8x32xf32>
    %25 = arith.addf %23, %24 : vector<8x32xf32>
    %26 = math.tanh %25 : vector<8x32xf32>
    %27 = arith.mulf %22, %26 : vector<8x32xf32>
    %28 = vector.extract_strided_slice %5 {offsets = [8, 0], sizes = [8, 128], strides = [1, 1]} : vector<64x128xf32> to vector<8x128xf32>
    %cst_11 = arith.constant dense<0.000000e+00> : vector<8x128xf32>
    %29 = tpu.matmul %27, %6, %cst_11 {dimension_numbers = #tpu.dot_dimension_numbers<[1], [0], [0], [1], [0, 0, 1, 1], [], []>} : vector<8x32xf32>, vector<32x128xf32>, vector<8x128xf32> -> vector<8x128xf32>
    %30 = arith.addf %28, %29 : vector<8x128xf32>
    %31 = vector.extract_strided_slice %30 {offsets = [0, 0], sizes = [8, 96], strides = [1, 1]} : vector<8x128xf32> to vector<8x96xf32>
    %32 = arith.negf %31 : vector<8x96xf32>
    %33 = math.exp %32 : vector<8x96xf32>
    %cst_12 = arith.constant 1.000000e+00 : f32
    %34 = vector.broadcast %cst_12 : f32 to vector<8x96xf32>
    %35 = arith.addf %34, %33 : vector<8x96xf32>
    %36 = arith.divf %34, %35 : vector<8x96xf32>
    %37 = vector.extract_strided_slice %30 {offsets = [0, 96], sizes = [8, 32], strides = [1, 1]} : vector<8x128xf32> to vector<8x32xf32>
    %38 = math.tanh %37 : vector<8x32xf32>
    %39 = vector.extract_strided_slice %36 {offsets = [0, 0], sizes = [8, 32], strides = [1, 1]} : vector<8x96xf32> to vector<8x32xf32>
    %40 = vector.extract_strided_slice %36 {offsets = [0, 32], sizes = [8, 32], strides = [1, 1]} : vector<8x96xf32> to vector<8x32xf32>
    %41 = vector.extract_strided_slice %36 {offsets = [0, 64], sizes = [8, 32], strides = [1, 1]} : vector<8x96xf32> to vector<8x32xf32>
    %42 = arith.mulf %40, %25 : vector<8x32xf32>
    %43 = arith.mulf %39, %38 : vector<8x32xf32>
    %44 = arith.addf %42, %43 : vector<8x32xf32>
    %45 = math.tanh %44 : vector<8x32xf32>
    %46 = arith.mulf %41, %45 : vector<8x32xf32>
    %47 = vector.extract_strided_slice %5 {offsets = [16, 0], sizes = [8, 128], strides = [1, 1]} : vector<64x128xf32> to vector<8x128xf32>
    %cst_13 = arith.constant dense<0.000000e+00> : vector<8x128xf32>
    %48 = tpu.matmul %46, %6, %cst_13 {dimension_numbers = #tpu.dot_dimension_numbers<[1], [0], [0], [1], [0, 0, 1, 1], [], []>} : vector<8x32xf32>, vector<32x128xf32>, vector<8x128xf32> -> vector<8x128xf32>
    %49 = arith.addf %47, %48 : vector<8x128xf32>
    %50 = vector.extract_strided_slice %49 {offsets = [0, 0], sizes = [8, 96], strides = [1, 1]} : vector<8x128xf32> to vector<8x96xf32>
    %51 = arith.negf %50 : vector<8x96xf32>
    %52 = math.exp %51 : vector<8x96xf32>
    %cst_14 = arith.constant 1.000000e+00 : f32
    %53 = vector.broadcast %cst_14 : f32 to vector<8x96xf32>
    %54 = arith.addf %53, %52 : vector<8x96xf32>
    %55 = arith.divf %53, %54 : vector<8x96xf32>
    %56 = vector.extract_strided_slice %49 {offsets = [0, 96], sizes = [8, 32], strides = [1, 1]} : vector<8x128xf32> to vector<8x32xf32>
    %57 = math.tanh %56 : vector<8x32xf32>
    %58 = vector.extract_strided_slice %55 {offsets = [0, 0], sizes = [8, 32], strides = [1, 1]} : vector<8x96xf32> to vector<8x32xf32>
    %59 = vector.extract_strided_slice %55 {offsets = [0, 32], sizes = [8, 32], strides = [1, 1]} : vector<8x96xf32> to vector<8x32xf32>
    %60 = vector.extract_strided_slice %55 {offsets = [0, 64], sizes = [8, 32], strides = [1, 1]} : vector<8x96xf32> to vector<8x32xf32>
    %61 = arith.mulf %59, %44 : vector<8x32xf32>
    %62 = arith.mulf %58, %57 : vector<8x32xf32>
    %63 = arith.addf %61, %62 : vector<8x32xf32>
    %64 = math.tanh %63 : vector<8x32xf32>
    %65 = arith.mulf %60, %64 : vector<8x32xf32>
    %66 = vector.extract_strided_slice %5 {offsets = [24, 0], sizes = [8, 128], strides = [1, 1]} : vector<64x128xf32> to vector<8x128xf32>
    %cst_15 = arith.constant dense<0.000000e+00> : vector<8x128xf32>
    %67 = tpu.matmul %65, %6, %cst_15 {dimension_numbers = #tpu.dot_dimension_numbers<[1], [0], [0], [1], [0, 0, 1, 1], [], []>} : vector<8x32xf32>, vector<32x128xf32>, vector<8x128xf32> -> vector<8x128xf32>
    %68 = arith.addf %66, %67 : vector<8x128xf32>
    %69 = vector.extract_strided_slice %68 {offsets = [0, 0], sizes = [8, 96], strides = [1, 1]} : vector<8x128xf32> to vector<8x96xf32>
    %70 = arith.negf %69 : vector<8x96xf32>
    %71 = math.exp %70 : vector<8x96xf32>
    %cst_16 = arith.constant 1.000000e+00 : f32
    %72 = vector.broadcast %cst_16 : f32 to vector<8x96xf32>
    %73 = arith.addf %72, %71 : vector<8x96xf32>
    %74 = arith.divf %72, %73 : vector<8x96xf32>
    %75 = vector.extract_strided_slice %68 {offsets = [0, 96], sizes = [8, 32], strides = [1, 1]} : vector<8x128xf32> to vector<8x32xf32>
    %76 = math.tanh %75 : vector<8x32xf32>
    %77 = vector.extract_strided_slice %74 {offsets = [0, 0], sizes = [8, 32], strides = [1, 1]} : vector<8x96xf32> to vector<8x32xf32>
    %78 = vector.extract_strided_slice %74 {offsets = [0, 32], sizes = [8, 32], strides = [1, 1]} : vector<8x96xf32> to vector<8x32xf32>
    %79 = vector.extract_strided_slice %74 {offsets = [0, 64], sizes = [8, 32], strides = [1, 1]} : vector<8x96xf32> to vector<8x32xf32>
    %80 = arith.mulf %78, %63 : vector<8x32xf32>
    %81 = arith.mulf %77, %76 : vector<8x32xf32>
    %82 = arith.addf %80, %81 : vector<8x32xf32>
    %83 = math.tanh %82 : vector<8x32xf32>
    %84 = arith.mulf %79, %83 : vector<8x32xf32>
    %85 = vector.extract_strided_slice %5 {offsets = [32, 0], sizes = [8, 128], strides = [1, 1]} : vector<64x128xf32> to vector<8x128xf32>
    %cst_17 = arith.constant dense<0.000000e+00> : vector<8x128xf32>
    %86 = tpu.matmul %84, %6, %cst_17 {dimension_numbers = #tpu.dot_dimension_numbers<[1], [0], [0], [1], [0, 0, 1, 1], [], []>} : vector<8x32xf32>, vector<32x128xf32>, vector<8x128xf32> -> vector<8x128xf32>
    %87 = arith.addf %85, %86 : vector<8x128xf32>
    %88 = vector.extract_strided_slice %87 {offsets = [0, 0], sizes = [8, 96], strides = [1, 1]} : vector<8x128xf32> to vector<8x96xf32>
    %89 = arith.negf %88 : vector<8x96xf32>
    %90 = math.exp %89 : vector<8x96xf32>
    %cst_18 = arith.constant 1.000000e+00 : f32
    %91 = vector.broadcast %cst_18 : f32 to vector<8x96xf32>
    %92 = arith.addf %91, %90 : vector<8x96xf32>
    %93 = arith.divf %91, %92 : vector<8x96xf32>
    %94 = vector.extract_strided_slice %87 {offsets = [0, 96], sizes = [8, 32], strides = [1, 1]} : vector<8x128xf32> to vector<8x32xf32>
    %95 = math.tanh %94 : vector<8x32xf32>
    %96 = vector.extract_strided_slice %93 {offsets = [0, 0], sizes = [8, 32], strides = [1, 1]} : vector<8x96xf32> to vector<8x32xf32>
    %97 = vector.extract_strided_slice %93 {offsets = [0, 32], sizes = [8, 32], strides = [1, 1]} : vector<8x96xf32> to vector<8x32xf32>
    %98 = vector.extract_strided_slice %93 {offsets = [0, 64], sizes = [8, 32], strides = [1, 1]} : vector<8x96xf32> to vector<8x32xf32>
    %99 = arith.mulf %97, %82 : vector<8x32xf32>
    %100 = arith.mulf %96, %95 : vector<8x32xf32>
    %101 = arith.addf %99, %100 : vector<8x32xf32>
    %102 = math.tanh %101 : vector<8x32xf32>
    %103 = arith.mulf %98, %102 : vector<8x32xf32>
    %104 = vector.extract_strided_slice %5 {offsets = [40, 0], sizes = [8, 128], strides = [1, 1]} : vector<64x128xf32> to vector<8x128xf32>
    %cst_19 = arith.constant dense<0.000000e+00> : vector<8x128xf32>
    %105 = tpu.matmul %103, %6, %cst_19 {dimension_numbers = #tpu.dot_dimension_numbers<[1], [0], [0], [1], [0, 0, 1, 1], [], []>} : vector<8x32xf32>, vector<32x128xf32>, vector<8x128xf32> -> vector<8x128xf32>
    %106 = arith.addf %104, %105 : vector<8x128xf32>
    %107 = vector.extract_strided_slice %106 {offsets = [0, 0], sizes = [8, 96], strides = [1, 1]} : vector<8x128xf32> to vector<8x96xf32>
    %108 = arith.negf %107 : vector<8x96xf32>
    %109 = math.exp %108 : vector<8x96xf32>
    %cst_20 = arith.constant 1.000000e+00 : f32
    %110 = vector.broadcast %cst_20 : f32 to vector<8x96xf32>
    %111 = arith.addf %110, %109 : vector<8x96xf32>
    %112 = arith.divf %110, %111 : vector<8x96xf32>
    %113 = vector.extract_strided_slice %106 {offsets = [0, 96], sizes = [8, 32], strides = [1, 1]} : vector<8x128xf32> to vector<8x32xf32>
    %114 = math.tanh %113 : vector<8x32xf32>
    %115 = vector.extract_strided_slice %112 {offsets = [0, 0], sizes = [8, 32], strides = [1, 1]} : vector<8x96xf32> to vector<8x32xf32>
    %116 = vector.extract_strided_slice %112 {offsets = [0, 32], sizes = [8, 32], strides = [1, 1]} : vector<8x96xf32> to vector<8x32xf32>
    %117 = vector.extract_strided_slice %112 {offsets = [0, 64], sizes = [8, 32], strides = [1, 1]} : vector<8x96xf32> to vector<8x32xf32>
    %118 = arith.mulf %116, %101 : vector<8x32xf32>
    %119 = arith.mulf %115, %114 : vector<8x32xf32>
    %120 = arith.addf %118, %119 : vector<8x32xf32>
    %121 = math.tanh %120 : vector<8x32xf32>
    %122 = arith.mulf %117, %121 : vector<8x32xf32>
    %123 = vector.extract_strided_slice %5 {offsets = [48, 0], sizes = [8, 128], strides = [1, 1]} : vector<64x128xf32> to vector<8x128xf32>
    %cst_21 = arith.constant dense<0.000000e+00> : vector<8x128xf32>
    %124 = tpu.matmul %122, %6, %cst_21 {dimension_numbers = #tpu.dot_dimension_numbers<[1], [0], [0], [1], [0, 0, 1, 1], [], []>} : vector<8x32xf32>, vector<32x128xf32>, vector<8x128xf32> -> vector<8x128xf32>
    %125 = arith.addf %123, %124 : vector<8x128xf32>
    %126 = vector.extract_strided_slice %125 {offsets = [0, 0], sizes = [8, 96], strides = [1, 1]} : vector<8x128xf32> to vector<8x96xf32>
    %127 = arith.negf %126 : vector<8x96xf32>
    %128 = math.exp %127 : vector<8x96xf32>
    %cst_22 = arith.constant 1.000000e+00 : f32
    %129 = vector.broadcast %cst_22 : f32 to vector<8x96xf32>
    %130 = arith.addf %129, %128 : vector<8x96xf32>
    %131 = arith.divf %129, %130 : vector<8x96xf32>
    %132 = vector.extract_strided_slice %125 {offsets = [0, 96], sizes = [8, 32], strides = [1, 1]} : vector<8x128xf32> to vector<8x32xf32>
    %133 = math.tanh %132 : vector<8x32xf32>
    %134 = vector.extract_strided_slice %131 {offsets = [0, 0], sizes = [8, 32], strides = [1, 1]} : vector<8x96xf32> to vector<8x32xf32>
    %135 = vector.extract_strided_slice %131 {offsets = [0, 32], sizes = [8, 32], strides = [1, 1]} : vector<8x96xf32> to vector<8x32xf32>
    %136 = vector.extract_strided_slice %131 {offsets = [0, 64], sizes = [8, 32], strides = [1, 1]} : vector<8x96xf32> to vector<8x32xf32>
    %137 = arith.mulf %135, %120 : vector<8x32xf32>
    %138 = arith.mulf %134, %133 : vector<8x32xf32>
    %139 = arith.addf %137, %138 : vector<8x32xf32>
    %140 = math.tanh %139 : vector<8x32xf32>
    %141 = arith.mulf %136, %140 : vector<8x32xf32>
    %142 = vector.extract_strided_slice %5 {offsets = [56, 0], sizes = [8, 128], strides = [1, 1]} : vector<64x128xf32> to vector<8x128xf32>
    %cst_23 = arith.constant dense<0.000000e+00> : vector<8x128xf32>
    %143 = tpu.matmul %141, %6, %cst_23 {dimension_numbers = #tpu.dot_dimension_numbers<[1], [0], [0], [1], [0, 0, 1, 1], [], []>} : vector<8x32xf32>, vector<32x128xf32>, vector<8x128xf32> -> vector<8x128xf32>
    %144 = arith.addf %142, %143 : vector<8x128xf32>
    %145 = vector.extract_strided_slice %144 {offsets = [0, 0], sizes = [8, 96], strides = [1, 1]} : vector<8x128xf32> to vector<8x96xf32>
    %146 = arith.negf %145 : vector<8x96xf32>
    %147 = math.exp %146 : vector<8x96xf32>
    %cst_24 = arith.constant 1.000000e+00 : f32
    %148 = vector.broadcast %cst_24 : f32 to vector<8x96xf32>
    %149 = arith.addf %148, %147 : vector<8x96xf32>
    %150 = arith.divf %148, %149 : vector<8x96xf32>
    %151 = vector.extract_strided_slice %144 {offsets = [0, 96], sizes = [8, 32], strides = [1, 1]} : vector<8x128xf32> to vector<8x32xf32>
    %152 = math.tanh %151 : vector<8x32xf32>
    %153 = vector.extract_strided_slice %150 {offsets = [0, 0], sizes = [8, 32], strides = [1, 1]} : vector<8x96xf32> to vector<8x32xf32>
    %154 = vector.extract_strided_slice %150 {offsets = [0, 32], sizes = [8, 32], strides = [1, 1]} : vector<8x96xf32> to vector<8x32xf32>
    %155 = vector.extract_strided_slice %150 {offsets = [0, 64], sizes = [8, 32], strides = [1, 1]} : vector<8x96xf32> to vector<8x32xf32>
    %156 = arith.mulf %154, %139 : vector<8x32xf32>
    %157 = arith.mulf %153, %152 : vector<8x32xf32>
    %158 = arith.addf %156, %157 : vector<8x32xf32>
    %159 = math.tanh %158 : vector<8x32xf32>
    %160 = arith.mulf %155, %159 : vector<8x32xf32>
    %161 = tpu.concatenate %27, %46, %65, %84, %103, %122, %141, %160 in 0 : vector<8x32xf32>, vector<8x32xf32>, vector<8x32xf32>, vector<8x32xf32>, vector<8x32xf32>, vector<8x32xf32>, vector<8x32xf32>, vector<8x32xf32> -> vector<64x32xf32>
    %c0_25 = arith.constant 0 : index
    %c0_26 = arith.constant 0 : index
    %162 = vector.load %arg4[%c0_25, %c0_26] : memref<32x16xf32, #tpu.memory_space<vmem>>, vector<32x16xf32>
    %c0_27 = arith.constant 0 : index
    %c0_28 = arith.constant 0 : index
    %163 = vector.load %arg5[%c0_27, %c0_28] : memref<1x16xf32, #tpu.memory_space<vmem>>, vector<1x16xf32>
    %cst_29 = arith.constant dense<0.000000e+00> : vector<64x16xf32>
    %164 = tpu.matmul %161, %162, %cst_29 {dimension_numbers = #tpu.dot_dimension_numbers<[1], [0], [0], [1], [0, 0, 1, 1], [], []>} : vector<64x32xf32>, vector<32x16xf32>, vector<64x16xf32> -> vector<64x16xf32>
    %165 = vector.broadcast %163 : vector<1x16xf32> to vector<64x16xf32>
    %166 = arith.addf %164, %165 : vector<64x16xf32>
    %cst_30 = arith.constant 0.000000e+00 : f32
    %167 = vector.broadcast %cst_30 : f32 to vector<64x16xf32>
    %168 = arith.maximumf %166, %167 : vector<64x16xf32>
    %c0_31 = arith.constant 0 : index
    %c0_32 = arith.constant 0 : index
    %169 = vector.load %arg6[%c0_31, %c0_32] : memref<16x8xf32, #tpu.memory_space<vmem>>, vector<16x8xf32>
    %c0_33 = arith.constant 0 : index
    %c0_34 = arith.constant 0 : index
    %170 = vector.load %arg7[%c0_33, %c0_34] : memref<1x8xf32, #tpu.memory_space<vmem>>, vector<1x8xf32>
    %cst_35 = arith.constant dense<0.000000e+00> : vector<64x8xf32>
    %171 = tpu.matmul %168, %169, %cst_35 {dimension_numbers = #tpu.dot_dimension_numbers<[1], [0], [0], [1], [0, 0, 1, 1], [], []>} : vector<64x16xf32>, vector<16x8xf32>, vector<64x8xf32> -> vector<64x8xf32>
    %172 = vector.broadcast %170 : vector<1x8xf32> to vector<64x8xf32>
    %173 = arith.addf %171, %172 : vector<64x8xf32>
    %c0_36 = arith.constant 0 : index
    %c0_37 = arith.constant 0 : index
    %174 = vector.load %arg8[%c0_36, %c0_37] : memref<64x8xf32, #tpu.memory_space<vmem>>, vector<64x8xf32>
    tpu.vector_store %arg8[%c0_36, %c0_37], %173 {strides = array<i32>} : memref<64x8xf32, #tpu.memory_space<vmem>>, vector<64x8xf32>,
    return
  }
}

</mosaic_0001>

<bundles_post_ra>
// kernel: tpu_custom_call.1
= control target key start
LH: loop header
LB: loop body
LE: loop exit
PB: predicated region body
PF: predicated region fallthrough
CT: control target
= control target key end

     0   :  { %vm70_vm0 = vcmask 1043456   ;;  %vm45_vm1 = vcmask 31744   ;;  %v1644_v0 = vmov 0.0|0.0   ;;  %vm1645_vm2 = vmmov 0   ;;  %s1647_s19 = smov 32   ;;  %s1962_s2 = inlined_call_operand.vmem [shape: f32[32,128], index: 2, kind: input, shape index: {}]   ;;  %s1963_s1 = inlined_call_operand.vmem [shape: f32[4,128], index: 1, kind: input, shape index: {}]   ;;  %s1964_s0 = inlined_call_operand.vmem [shape: f32[64,4], index: 0, kind: input, shape index: {}]   ;;  %s1965_s3 = inlined_call_operand.vmem [shape: f32[1,128], index: 3, kind: input, shape index: {}]   ;;  %s1966_s4 = inlined_call_operand.vmem [shape: f32[32,16], index: 4, kind: input, shape index: {}]   ;;  %s1967_s6 = inlined_call_operand.vmem [shape: f32[16,8], index: 6, kind: input, shape index: {}]   ;;  %s1968_s5 = inlined_call_operand.vmem [shape: f32[1,16], index: 5, kind: input, shape index: {}]   ;;  %s1969_s7 = inlined_call_operand.vmem [shape: f32[1,8], index: 7, kind: input, shape index: {}]   ;;  %s1970_s8 = inlined_call_operand.vmem [shape: f32[64,8], index: 8, kind: output, shape index: {}]  }
   0x1   :  { %1515 = vmatprep.subr.bf16.mxu1 %v1644_v0  ;;  %v179_v1 = vld [vmem:[%s1962_s2] sm:$0xff]  ;;  %v180_v2 = vld [vmem:[%s1962_s2 + $0x8] sm:$0xff]  ;;  %v181_v7 = vld [vmem:[%s1962_s2 + $0x10] sm:$0xff]  ;;  %v1646_v8 = vmov 0.0   ;;  %vm183_vm3 = vcmask 261120   ;;  %vm1120_vm4 = vcmask 130048  }
   0x2   :  { %v37_v3 = vld [vmem:[%s1963_s1] sm:$0xf]  ;;  %v1704_v4 = vpack.c.bf16 %v180_v2, %v179_v1  ;;  %v30_v6 = vld [vmem:[%s1964_s0 + $0x8] sm:$0xff]  ;;  %1399 = vmatprep.mubr.msk.f32.mxu1 %vm1645_vm2, %v1646_v8  ;;  %v182_v9 = vld [vmem:[%s1962_s2 + $0x18] sm:$0xff]  ;;  %vm1250_vm5 = vcmask 64512  }
   0x3   :  { %1377 = vmatprep.subr.msk.mxu0 %vm70_vm0, %v37_v3  ;;  %v29_v5 = vld [vmem:[%s1964_s0] sm:$0xff]  ;;  %v1725_v10 = vpack.c.bf16 %v182_v9, %v181_v7  ;;  %v31_v46 = vld [vmem:[%s1964_s0 + $0x10] sm:$0xff]  ;;  %v32_v47 = vld [vmem:[%s1964_s0 + $0x18] sm:$0xff] }
   0x4   :  { %1378 = vmatpush3.msk.msra.mxu0 %vm70_vm0, %v37_v3  ;;  %1379 = vmatprep.mubr.msk.f32.mxu0 %vm45_vm1, %v29_v5  ;;  %v1745_v12 = vld [vmem:[%s1965_s3] ss:$0 sm:$0xff]  ;;  %s1648_s3 = smov 64   ;;  %v34_v49 = vld [vmem:[%s1964_s0 + $0x28] sm:$0xff]  ;;  %v35_v50 = vld [vmem:[%s1964_s0 + $0x30] sm:$0xff] }
   0x5   :  { %1517 = vmatpush3.bf16.msra.mxu1 %v1704_v4  ;;  %1380 = vmatmul.mubr.msk.f32.vlgmr.msra.gmra.mrb[0].mxu0 %vm45_vm1, %v30_v6  ;;  %v33_v48 = vld [vmem:[%s1964_s0 + $0x20] sm:$0xff]  ;;  %v36_v51 = vld [vmem:[%s1964_s0 + $0x38] sm:$0xff] }
   0x6   :  { %1518 = vmatprep.subr.bf16.mxu1 %v1644_v0  ;;  %1527 = vmatprep.subr.bf16.mxu0 %v1644_v0 }
   0x7   :  { %1529 = vmatpush3.bf16.msra.mxu0 %v1704_v4  ;;  %1382 = vmatprep.mubr.msk.f32.mxu0 %vm45_vm1, %v31_v46 }
   0x8   :  { %1530 = vmatprep.subr.bf16.mxu0 %v1644_v0 }
   0x9   :  { %1520 = vmatpush3.bf16.msra.mxu1 %v1725_v10  ;;  %1383 = vmatmul.mubr.msk.f32.gmra.mrb[2].mxu0 %vm45_vm1, %v32_v47 }
   0xa   :  { %1521 = vmatprep.subr.bf16.mxu1 %v1644_v0  ;;  %1385 = vmatprep.mubr.msk.f32.mxu0 %vm45_vm1, %v33_v48 }
   0xb   :  { %1532 = vmatpush3.bf16.msra.mxu0 %v1725_v10 }
   0xc   :  { %1400 = vmatmul.mubr.f32.vlgmr.msra.gmra.mrb[0].mxu1 %v1646_v8  ;;  %1539 = vmatprep.subr.bf16.mxu0 %v1644_v0 }
   0xd   :  { %1523 = vmatpush3.bf16.msra.mxu1 %v1704_v4  ;;  %1410 = vmatprep.mubr.msk.f32.mxu1 %vm1645_vm2, %v1646_v8 }
   0xe   :  { %1524 = vmatprep.subr.bf16.mxu1 %v1644_v0  ;;  %1386 = vmatmul.mubr.msk.f32.gmra.mrb[4].mxu0 %vm45_vm1, %v34_v49 }
   0xf   :  { %1388 = vmatprep.mubr.msk.f32.mxu0 %vm45_vm1, %v35_v50 }
  0x11   :  { %1526 = vmatpush3.bf16.msra.mxu1 %v1725_v10 }
  0x12   :  { %1533 = vmatprep.subr.bf16.mxu1 %v1644_v0  ;;  %1389 = vmatmul.mubr.msk.f32.gmra.mrb[6].mxu0 %vm45_vm1, %v36_v51 }
  0x13   :  { %1421 = vmatprep.mubr.msk.f32.mxu0 %vm1645_vm2, %v1646_v8 }
  0xd8   :  { %v1381_v11 = vpop.f32.mrb[0].mxu0 }
  0xd9   :  { %v140_v13 = vpop.f32.mrb[1].mxu0  ;;  %v146_v32 = vadd.f32 %v1381_v11, %v1745_v12 }
  0xda   :  { %v141_v14 = vadd.f32 %v1745_v12, %v140_v13 }
  0xdc   :  { %v1384_v55 = vpop.f32.mrb[2].mxu0 }
  0xdd   :  { %v150_v56 = vpop.f32.mrb[3].mxu0 }
  0xde   :  { %v151_v62 = vadd.f32 %v1745_v12, %v150_v56 }
  0xdf   :  { %v253_v15 = vpop.f32.mrb[0].mxu1 }
  0xe0   :  { %v257_v16 = vadd.f32 %v253_v15, %v141_v14  ;;  %v1401_v17 = vpop.f32.mrb[1].mxu1 }
  0xe1   :  { %v1793_v57 = vpop.f32.mrb[4].mxu0 }
  0xe2   :  { %1580 = vtanh.f32 %v257_v16  ;;  %v1273_v19 = vmul.f32 -1.442695, %v257_v16  ;;  %v1795_v58 = vpop.f32.mrb[5].mxu0 }
  0xe4   :  { %1582 = vpow2.f32 %v1273_v19 }
  0xe5   :  { %v1797_v59 = vpop.f32.mrb[6].mxu0 }
  0xe6   :  { %v1799_v60 = vpop.f32.mrb[7].mxu0 }
  0xec   :  { %v1581_v18 = vpop.eup %1580 }
  0xed   :  { %267 = vrot.lane.b32.xlu0 %v1581_v18, %s1647_s19 }
  0xee   :  { %v1583_v20 = vpop.eup %1582 }
  0xef   :  { %v261_v21 = vadd.f32 1.0, %v1583_v20 }
  0xf1   :  { %1584 = vrcp.f32 %v261_v21  ;;  %v156_v21 = vadd.f32 %v1384_v55, %v1745_v12 }
  0xfb   :  { %v1585_v22 = vpop.eup %1584 }
  0xfc   :  { %v265_v25 = vmul.f32 0.0, %v1585_v22 }
 0x15f   :  { %v268_v23 = vpop.permute.xlu0 %267 }
 0x160   :  { %v270_v24 = vmul.f32 %v1585_v22, %v268_v23 }
 0x162   :  { %272 = vrot.lane.b32.xlu0 %v270_v24, %s1647_s19 }
 0x1d4   :  { %v273_v26 = vpop.permute.xlu0 %272 }
 0x1d5   :  { %v275_v27 = vadd.f32 %v273_v26, %v265_v25 }
 0x1d7   :  { %1586 = vtanh.f32 %v275_v27 }
 0x1e1   :  { %v1587_v28 = vpop.eup %1586 }
 0x1e2   :  { %278 = vrot.lane.b32.xlu1 %v1587_v28, %s1647_s19 }
 0x254   :  { %v279_v29 = vpop.permute.xlu1 %278 }
 0x255   :  { %v281_v30 = vmul.f32 %v1585_v22, %v279_v29 }
 0x257   :  { %283 = vrot.lane.b32.xlu1 %v281_v30, %s1648_s3 }
 0x2c9   :  { %v1752_v31 = vpop.permute.xlu1 %283 }
 0x2ca   :  { %1411 = vmatmul.mubr.msk.f32.vlgmr.msra.gmra.mrb[2].mxu1 %vm183_vm3, %v1752_v31 }
 0x2cb   :  { %1535 = vmatpush3.bf16.msra.mxu1 %v1704_v4  ;;  %1432 = vmatprep.mubr.msk.f32.mxu1 %vm1645_vm2, %v1646_v8 }
 0x2cc   :  { %1536 = vmatprep.subr.bf16.mxu1 %v1644_v0 }
 0x2cf   :  { %1538 = vmatpush3.bf16.msra.mxu1 %v1725_v10 }
 0x2d0   :  { %1545 = vmatprep.subr.bf16.mxu1 %v1644_v0 }
 0x39d   :  { %v353_v33 = vpop.f32.mrb[2].mxu1 }
 0x39e   :  { %v357_v34 = vadd.f32 %v353_v33, %v146_v32  ;;  %v1412_v35 = vpop.f32.mrb[3].mxu1 }
 0x3a0   :  { %1588 = vtanh.f32 %v357_v34  ;;  %v1275_v37 = vmul.f32 -1.442695, %v357_v34 }
 0x3a2   :  { %1590 = vpow2.f32 %v1275_v37 }
 0x3aa   :  { %v1589_v36 = vpop.eup %1588 }
 0x3ab   :  { %367 = vrot.lane.b32.xlu0 %v1589_v36, %s1647_s19 }
 0x3ac   :  { %v1591_v38 = vpop.eup %1590 }
 0x3ad   :  { %v361_v39 = vadd.f32 1.0, %v1591_v38 }
 0x3af   :  { %1592 = vrcp.f32 %v361_v39 }
 0x3b9   :  { %v1593_v40 = vpop.eup %1592 }
 0x3ba   :  { %v365_v43 = vmul.f32 %v1593_v40, %v275_v27 }
 0x41d   :  { %v368_v41 = vpop.permute.xlu0 %367 }
 0x41e   :  { %v370_v42 = vmul.f32 %v1593_v40, %v368_v41 }
 0x420   :  { %372 = vrot.lane.b32.xlu1 %v370_v42, %s1647_s19 }
 0x492   :  { %v373_v44 = vpop.permute.xlu1 %372 }
 0x493   :  { %v375_v45 = vadd.f32 %v373_v44, %v365_v43 }
 0x495   :  { %1594 = vtanh.f32 %v375_v45 }
 0x49f   :  { %v1595_v52 = vpop.eup %1594 }
 0x4a0   :  { %378 = vrot.lane.b32.xlu0 %v1595_v52, %s1647_s19 }
 0x512   :  { %v379_v53 = vpop.permute.xlu0 %378 }
 0x513   :  { %v381_v54 = vmul.f32 %v1593_v40, %v379_v53  ;;  %v161_v40 = vadd.f32 %v1745_v12, %v1795_v58 }
 0x515   :  { %383 = vrot.lane.b32.xlu1 %v381_v54, %s1648_s3 }
 0x587   :  { %v1801_v61 = vpop.permute.xlu1 %383 }
 0x588   :  { %1422 = vmatmul.mubr.msk.f32.vlgmr.msra.gmra.mrb[8].mxu0 %vm183_vm3, %v1801_v61 }
 0x589   :  { %1541 = vmatpush3.bf16.msra.mxu0 %v1704_v4  ;;  %1443 = vmatprep.mubr.msk.f32.mxu0 %vm1645_vm2, %v1646_v8 }
 0x58a   :  { %1542 = vmatprep.subr.bf16.mxu0 %v1644_v0 }
 0x58d   :  { %1544 = vmatpush3.bf16.msra.mxu0 %v1725_v10 }
 0x58e   :  { %1551 = vmatprep.subr.bf16.mxu0 %v1644_v0 }
 0x65b   :  { %v453_v63 = vpop.f32.mrb[8].mxu0 }
 0x65c   :  { %v457_v1 = vadd.f32 %v453_v63, %v151_v62  ;;  %v1423_v2 = vpop.f32.mrb[9].mxu0  ;;  %v166_v62 = vadd.f32 %v1793_v57, %v1745_v12 }
 0x65e   :  { %1596 = vtanh.f32 %v457_v1  ;;  %v1277_v5 = vmul.f32 -1.442695, %v457_v1 }
 0x660   :  { %1598 = vpow2.f32 %v1277_v5 }
 0x668   :  { %v1597_v3 = vpop.eup %1596 }
 0x669   :  { %467 = vrot.lane.b32.xlu0 %v1597_v3, %s1647_s19 }
 0x66a   :  { %v1599_v6 = vpop.eup %1598 }
 0x66b   :  { %v461_v7 = vadd.f32 1.0, %v1599_v6 }
 0x66d   :  { %1600 = vrcp.f32 %v461_v7 }
 0x677   :  { %v1601_v9 = vpop.eup %1600 }
 0x678   :  { %v465_v14 = vmul.f32 %v1601_v9, %v375_v45 }
 0x6db   :  { %v468_v11 = vpop.permute.xlu0 %467 }
 0x6dc   :  { %v470_v13 = vmul.f32 %v1601_v9, %v468_v11  ;;  %v982_v11 = vld [vmem:[%s1966_s4] sm:$0xff] }
 0x6de   :  { %472 = vrot.lane.b32.xlu1 %v470_v13, %s1647_s19  ;;  %v983_v13 = vld [vmem:[%s1966_s4 + $0x8] sm:$0xff] }
 0x750   :  { %v473_v15 = vpop.permute.xlu1 %472 }
 0x751   :  { %v475_v16 = vadd.f32 %v473_v15, %v465_v14  ;;  %v1563_v14 = vpack.c.bf16 %v983_v13, %v982_v11 }
 0x753   :  { %1602 = vtanh.f32 %v475_v16 }
 0x75d   :  { %v1603_v17 = vpop.eup %1602 }
 0x75e   :  { %478 = vrot.lane.b32.xlu0 %v1603_v17, %s1647_s19 }
 0x7d0   :  { %v479_v18 = vpop.permute.xlu0 %478 }
 0x7d1   :  { %v481_v19 = vmul.f32 %v1601_v9, %v479_v18  ;;  %v984_v18 = vld [vmem:[%s1966_s4 + $0x10] sm:$0xff] }
 0x7d3   :  { %483 = vrot.lane.b32.xlu1 %v481_v19, %s1648_s3  ;;  %v985_v19 = vld [vmem:[%s1966_s4 + $0x18] sm:$0xff] }
 0x845   :  { %v1816_v20 = vpop.permute.xlu1 %483 }
 0x846   :  { %1433 = vmatmul.mubr.msk.f32.vlgmr.msra.gmra.mrb[4].mxu1 %vm183_vm3, %v1816_v20 }
 0x847   :  { %1547 = vmatpush3.bf16.msra.mxu1 %v1704_v4  ;;  %1454 = vmatprep.mubr.msk.f32.mxu1 %vm1645_vm2, %v1646_v8 }
 0x848   :  { %1548 = vmatprep.subr.bf16.mxu1 %v1644_v0 }
 0x84b   :  { %1550 = vmatpush3.bf16.msra.mxu1 %v1725_v10 }
 0x84c   :  { %1557 = vmatprep.subr.bf16.mxu1 %v1644_v0 }
 0x919   :  { %v553_v22 = vpop.f32.mrb[4].mxu1 }
 0x91a   :  { %v557_v23 = vadd.f32 %v553_v22, %v156_v21  ;;  %v1434_v24 = vpop.f32.mrb[5].mxu1  ;;  %v1567_v21 = vpack.c.bf16 %v985_v19, %v984_v18 }
 0x91c   :  { %1604 = vtanh.f32 %v557_v23  ;;  %v1279_v26 = vmul.f32 -1.442695, %v557_v23  ;;  %v171_v23 = vadd.f32 %v1745_v12, %v1799_v60 }
 0x91e   :  { %1606 = vpow2.f32 %v1279_v26 }
 0x926   :  { %v1605_v25 = vpop.eup %1604 }
 0x927   :  { %567 = vrot.lane.b32.xlu0 %v1605_v25, %s1647_s19 }
 0x928   :  { %v1607_v27 = vpop.eup %1606 }
 0x929   :  { %v561_v28 = vadd.f32 1.0, %v1607_v27 }
 0x92b   :  { %1608 = vrcp.f32 %v561_v28 }
 0x935   :  { %v1609_v29 = vpop.eup %1608 }
 0x936   :  { %v565_v33 = vmul.f32 %v1609_v29, %v475_v16 }
 0x999   :  { %v568_v30 = vpop.permute.xlu0 %567 }
 0x99a   :  { %v570_v32 = vmul.f32 %v1609_v29, %v568_v30 }
 0x99c   :  { %572 = vrot.lane.b32.xlu1 %v570_v32, %s1647_s19 }
 0xa0e   :  { %v573_v34 = vpop.permute.xlu1 %572 }
 0xa0f   :  { %v575_v35 = vadd.f32 %v573_v34, %v565_v33 }
 0xa11   :  { %1610 = vtanh.f32 %v575_v35 }
 0xa1b   :  { %v1611_v36 = vpop.eup %1610 }
 0xa1c   :  { %578 = vrot.lane.b32.xlu0 %v1611_v36, %s1647_s19 }
 0xa8e   :  { %v579_v37 = vpop.permute.xlu0 %578 }
 0xa8f   :  { %v581_v38 = vmul.f32 %v1609_v29, %v579_v37 }
 0xa91   :  { %583 = vrot.lane.b32.xlu1 %v581_v38, %s1648_s3 }
 0xb03   :  { %v1831_v39 = vpop.permute.xlu1 %583 }
 0xb04   :  { %1444 = vmatmul.mubr.msk.f32.vlgmr.msra.gmra.mrb[10].mxu0 %vm183_vm3, %v1831_v39 }
 0xb05   :  { %1553 = vmatpush3.bf16.msra.mxu0 %v1704_v4  ;;  %1465 = vmatprep.mubr.msk.f32.mxu0 %vm1645_vm2, %v1646_v8 }
 0xb06   :  { %1554 = vmatprep.subr.bf16.mxu0 %v1644_v0 }
 0xb09   :  { %1556 = vmatpush3.bf16.msra.mxu0 %v1725_v10 }
 0xb0a   :  { %1564 = vmatprep.subr.bf16.mxu0 %v1563_v14 }
 0xbd7   :  { %v653_v41 = vpop.f32.mrb[10].mxu0 }
 0xbd8   :  { %v657_v42 = vadd.f32 %v653_v41, %v161_v40  ;;  %v1445_v43 = vpop.f32.mrb[11].mxu0  ;;  %v1111_v41 = vld [vmem:[%s1967_s6] sm:$0xff] }
 0xbda   :  { %1612 = vtanh.f32 %v657_v42  ;;  %v1281_v45 = vmul.f32 -1.442695, %v657_v42  ;;  %v1112_v42 = vld [vmem:[%s1967_s6 + $0x8] sm:$0xff] }
 0xbdb   :  { %v1571_v43 = vpack.c.bf16 %v1112_v42, %v1111_v41 }
 0xbdc   :  { %1614 = vpow2.f32 %v1281_v45 }
 0xbe4   :  { %v1613_v44 = vpop.eup %1612 }
 0xbe5   :  { %667 = vrot.lane.b32.xlu0 %v1613_v44, %s1647_s19 }
 0xbe6   :  { %v1615_v46 = vpop.eup %1614 }
 0xbe7   :  { %v661_v47 = vadd.f32 1.0, %v1615_v46  ;;  %v1899_v46 = vld [vmem:[%s1968_s5] ss:$0 sm:$0xff] }
 0xbe9   :  { %1616 = vrcp.f32 %v661_v47 }
 0xbf3   :  { %v1617_v48 = vpop.eup %1616 }
 0xbf4   :  { %v665_v51 = vmul.f32 %v1617_v48, %v575_v35 }
 0xc57   :  { %v668_v49 = vpop.permute.xlu0 %667 }
 0xc58   :  { %v670_v50 = vmul.f32 %v1617_v48, %v668_v49 }
 0xc5a   :  { %672 = vrot.lane.b32.xlu1 %v670_v50, %s1647_s19 }
 0xccc   :  { %v673_v52 = vpop.permute.xlu1 %672 }
 0xccd   :  { %v675_v53 = vadd.f32 %v673_v52, %v665_v51 }
 0xccf   :  { %1618 = vtanh.f32 %v675_v53 }
 0xcd9   :  { %v1619_v54 = vpop.eup %1618 }
 0xcda   :  { %678 = vrot.lane.b32.xlu0 %v1619_v54, %s1647_s19 }
 0xd4c   :  { %v679_v55 = vpop.permute.xlu0 %678 }
 0xd4d   :  { %v681_v56 = vmul.f32 %v1617_v48, %v679_v55 }
 0xd4f   :  { %683 = vrot.lane.b32.xlu1 %v681_v56, %s1648_s3 }
 0xdc1   :  { %v684_v58 = vpop.permute.xlu1 %683 }
 0xdc2   :  { %1455 = vmatmul.mubr.msk.f32.vlgmr.msra.gmra.mrb[6].mxu1 %vm183_vm3, %v684_v58 }
 0xdc3   :  { %1559 = vmatpush3.bf16.msra.mxu1 %v1704_v4  ;;  %1476 = vmatprep.mubr.msk.f32.mxu1 %vm1645_vm2, %v1646_v8 }
 0xdc4   :  { %1560 = vmatprep.subr.bf16.mxu1 %v1644_v0 }
 0xdc7   :  { %1562 = vmatpush3.bf16.msra.mxu1 %v1725_v10 }
 0xdc8   :  { %1572 = vmatprep.subr.bf16.mxu1 %v1571_v43 }
 0xe95   :  { %v753_v63 = vpop.f32.mrb[6].mxu1 }
 0xe96   :  { %v757_v1 = vadd.f32 %v753_v63, %v166_v62  ;;  %v1456_v2 = vpop.f32.mrb[7].mxu1 }
 0xe98   :  { %1620 = vtanh.f32 %v757_v1  ;;  %v1283_v5 = vmul.f32 -1.442695, %v757_v1  ;;  %v176_v1 = vadd.f32 %v1797_v59, %v1745_v12 }
 0xe9a   :  { %1622 = vpow2.f32 %v1283_v5 }
 0xea2   :  { %v1621_v3 = vpop.eup %1620 }
 0xea3   :  { %767 = vrot.lane.b32.xlu0 %v1621_v3, %s1647_s19 }
 0xea4   :  { %v1623_v4 = vpop.eup %1622 }
 0xea5   :  { %v761_v6 = vadd.f32 1.0, %v1623_v4  ;;  %v1297_v4 = vld [vmem:[%s1969_s7] ss:$0 sm:$0xff] }
 0xea7   :  { %1624 = vrcp.f32 %v761_v6 }
 0xeb1   :  { %v1625_v8 = vpop.eup %1624 }
 0xeb2   :  { %v765_v10 = vmul.f32 %v1625_v8, %v675_v53 }
 0xf15   :  { %v768_v7 = vpop.permute.xlu0 %767 }
 0xf16   :  { %v770_v0 = vmul.f32 %v1625_v8, %v768_v7 }
 0xf18   :  { %772 = vrot.lane.b32.xlu1 %v770_v0, %s1647_s19 }
 0xf8a   :  { %v773_v9 = vpop.permute.xlu1 %772 }
 0xf8b   :  { %v775_v57 = vadd.f32 %v773_v9, %v765_v10 }
 0xf8d   :  { %1626 = vtanh.f32 %v775_v57 }
 0xf97   :  { %v1627_v15 = vpop.eup %1626 }
 0xf98   :  { %778 = vrot.lane.b32.xlu0 %v1627_v15, %s1647_s19 }
0x100a   :  { %v779_v16 = vpop.permute.xlu0 %778 }
0x100b   :  { %v781_v17 = vmul.f32 %v1625_v8, %v779_v16 }
0x100d   :  { %783 = vrot.lane.b32.xlu1 %v781_v17, %s1648_s3 }
0x107f   :  { %v784_v22 = vpop.permute.xlu1 %783 }
0x1080   :  { %1466 = vmatmul.mubr.msk.f32.vlgmr.msra.gmra.mrb[12].mxu0 %vm183_vm3, %v784_v22 }
0x1081   :  { %1566 = vmatpush3.bf16.msra.mxu0 %v1563_v14  ;;  %1487 = vmatprep.mubr.msk.f32.mxu0 %vm183_vm3, %v1752_v31 }
0x1082   :  { %1568 = vmatprep.subr.bf16.mxu0 %v1567_v21 }
0x1085   :  { %1570 = vmatpush3.bf16.msra.mxu0 %v1567_v21 }
0x1088   :  { %1488 = vmatmul.mubr.msk.f32.vlgmr.msra.gmra.mrb[14].mxu0 %vm183_vm3, %v1801_v61 }
0x1089   :  { %1490 = vmatprep.mubr.msk.f32.mxu0 %vm183_vm3, %v1816_v20 }
0x108c   :  { %1491 = vmatmul.mubr.msk.f32.gmra.mrb[16].mxu0 %vm183_vm3, %v1831_v39 }
0x108d   :  { %1493 = vmatprep.mubr.msk.f32.mxu0 %vm183_vm3, %v684_v58 }
0x1090   :  { %1494 = vmatmul.mubr.msk.f32.gmra.mrb[18].mxu0 %vm183_vm3, %v784_v22 }
0x1153   :  { %v853_v24 = vpop.f32.mrb[12].mxu0 }
0x1154   :  { %v857_v31 = vadd.f32 %v853_v24, %v171_v23  ;;  %v1467_v25 = vpop.f32.mrb[13].mxu0 }
0x1156   :  { %1628 = vtanh.f32 %v857_v31  ;;  %v1285_v32 = vmul.f32 -1.442695, %v857_v31 }
0x1158   :  { %1630 = vpow2.f32 %v1285_v32 }
0x115b   :  { %v1489_v26 = vpop.f32.mrb[14].mxu0 }
0x115c   :  { %v1064_v27 = vpop.f32.mrb[15].mxu0  ;;  %v1070_v48 = vadd.f32 %v1489_v26, %v1899_v46 }
0x115d   :  { %v1065_v47 = vadd.f32 %v1899_v46, %v1064_v27 }
0x115e   :  { %v1104_v52 = vmax.f32 %v1070_v48, 0.0 }
0x115f   :  { %v1492_v61 = vpop.f32.mrb[16].mxu0  ;;  %v1103_v49 = vmax.f32 %v1065_v47, 0.0 }
0x1160   :  { %v1629_v28 = vpop.eup %1628  ;;  %v1074_v29 = vpop.f32.mrb[17].mxu0  ;;  %v1080_v53 = vadd.f32 %v1492_v61, %v1899_v46 }
0x1161   :  { %867 = vrot.lane.b32.xlu0 %v1629_v28, %s1647_s19  ;;  %v1075_v50 = vadd.f32 %v1899_v46, %v1074_v29 }
0x1162   :  { %v1631_v33 = vpop.eup %1630  ;;  %v1106_v56 = vmax.f32 %v1080_v53, 0.0 }
0x1163   :  { %v1495_v20 = vpop.f32.mrb[18].mxu0  ;;  %v861_v34 = vadd.f32 1.0, %v1631_v33  ;;  %v1105_v54 = vmax.f32 %v1075_v50, 0.0 }
0x1164   :  { %v1084_v30 = vpop.f32.mrb[19].mxu0  ;;  %v1090_v58 = vadd.f32 %v1495_v20, %v1899_v46 }
0x1165   :  { %1632 = vrcp.f32 %v861_v34  ;;  %v1085_v55 = vadd.f32 %v1899_v46, %v1084_v30 }
0x1166   :  { %v1108_v63 = vmax.f32 %v1090_v58, 0.0 }
0x1167   :  { %v1107_v62 = vmax.f32 %v1085_v55, 0.0 }
0x116f   :  { %v1633_v35 = vpop.eup %1632 }
0x1170   :  { %v865_v37 = vmul.f32 %v1633_v35, %v775_v57 }
0x11d3   :  { %v868_v60 = vpop.permute.xlu0 %867 }
0x11d4   :  { %v870_v36 = vmul.f32 %v1633_v35, %v868_v60 }
0x11d6   :  { %872 = vrot.lane.b32.xlu1 %v870_v36, %s1647_s19 }
0x1248   :  { %v873_v38 = vpop.permute.xlu1 %872 }
0x1249   :  { %v1885_v39 = vadd.f32 %v873_v38, %v865_v37 }
0x124b   :  { %1634 = vtanh.f32 %v1885_v39 }
0x1255   :  { %v1635_v40 = vpop.eup %1634 }
0x1256   :  { %878 = vrot.lane.b32.xlu0 %v1635_v40, %s1647_s19 }
0x12c8   :  { %v879_v44 = vpop.permute.xlu0 %878 }
0x12c9   :  { %v881_v45 = vmul.f32 %v1633_v35, %v879_v44 }
0x12cb   :  { %883 = vrot.lane.b32.xlu1 %v881_v45, %s1648_s3 }
0x133d   :  { %v884_v51 = vpop.permute.xlu1 %883 }
0x133e   :  { %1477 = vmatmul.mubr.msk.f32.vlgmr.msra.gmra.mrb[8].mxu1 %vm183_vm3, %v884_v51  ;;  %1496 = vmatprep.mubr.msk.f32.mxu0 %vm183_vm3, %v884_v51 }
0x133f   :  { %1574 = vmatpush3.bf16.msra.mxu1 %v1571_v43  ;;  %1503 = vmatprep.mubr.msk.f32.mxu1 %vm1120_vm4, %v1103_v49 }
0x1342   :  { %1504 = vmatmul.mubr.msk.f32.vlgmr.msra.gmra.mrb[10].mxu1 %vm1120_vm4, %v1104_v52 }
0x1343   :  { %1506 = vmatprep.mubr.msk.f32.mxu1 %vm1120_vm4, %v1105_v54 }
0x1346   :  { %1507 = vmatmul.mubr.msk.f32.gmra.mrb[12].mxu1 %vm1120_vm4, %v1106_v56 }
0x1347   :  { %1509 = vmatprep.mubr.msk.f32.mxu1 %vm1120_vm4, %v1107_v62 }
0x134a   :  { %1510 = vmatmul.mubr.msk.f32.gmra.mrb[14].mxu1 %vm1120_vm4, %v1108_v63 }
0x1411   :  { %v953_v2 = vpop.f32.mrb[8].mxu1 }
0x1412   :  { %v957_v3 = vadd.f32 %v953_v2, %v176_v1  ;;  %v1478_v5 = vpop.f32.mrb[9].mxu1 }
0x1414   :  { %1636 = vtanh.f32 %v957_v3  ;;  %v1287_v16 = vmul.f32 -1.442695, %v957_v3 }
0x1415   :  { %v1505_v6 = vpop.f32.mrb[10].mxu1 }
0x1416   :  { %v1217_v8 = vadd.f32 %v1505_v6, %v1297_v4  ;;  %v1211_v7 = vpop.f32.mrb[11].mxu1  ;;  %1638 = vpow2.f32 %v1287_v16 }
0x1417   :  { %v1212_v0 = vadd.f32 %v1297_v4, %v1211_v7 }
0x1418   :  { %1252 = vst.msk [vmem:[%s1970_s8 + $0x8] sm:$0xff] %vm1250_vm5, %v1217_v8 }
0x1419   :  { %1251 = vst.msk [vmem:[%s1970_s8] sm:$0xff] %vm1250_vm5, %v1212_v0  ;;  %v1508_v12 = vpop.f32.mrb[12].mxu1 }
0x141a   :  { %v1227_v59 = vadd.f32 %v1508_v12, %v1297_v4  ;;  %v1221_v10 = vpop.f32.mrb[13].mxu1 }
0x141b   :  { %v1222_v9 = vadd.f32 %v1297_v4, %v1221_v10 }
0x141c   :  { %1254 = vst.msk [vmem:[%s1970_s8 + $0x18] sm:$0xff] %vm1250_vm5, %v1227_v59 }
0x141d   :  { %1253 = vst.msk [vmem:[%s1970_s8 + $0x10] sm:$0xff] %vm1250_vm5, %v1222_v9  ;;  %v1511_v57 = vpop.f32.mrb[14].mxu1 }
0x141e   :  { %v1637_v11 = vpop.eup %1636  ;;  %v1237_v13 = vadd.f32 %v1511_v57, %v1297_v4  ;;  %v1231_v14 = vpop.f32.mrb[15].mxu1 }
0x141f   :  { %v1232_v15 = vadd.f32 %v1297_v4, %v1231_v14  ;;  %967 = vrot.lane.b32.xlu0 %v1637_v11, %s1647_s19 }
0x1420   :  { %1256 = vst.msk [vmem:[%s1970_s8 + $0x28] sm:$0xff] %vm1250_vm5, %v1237_v13  ;;  %v1639_v17 = vpop.eup %1638 }
0x1421   :  { %1255 = vst.msk [vmem:[%s1970_s8 + $0x20] sm:$0xff] %vm1250_vm5, %v1232_v15  ;;  %v961_v18 = vadd.f32 1.0, %v1639_v17 }
0x1423   :  { %1640 = vrcp.f32 %v961_v18 }
0x142d   :  { %v1641_v19 = vpop.eup %1640 }
0x142e   :  { %v965_v23 = vmul.f32 %v1641_v19, %v1885_v39 }
0x1491   :  { %v968_v21 = vpop.permute.xlu0 %967 }
0x1492   :  { %v970_v22 = vmul.f32 %v1641_v19, %v968_v21 }
0x1494   :  { %972 = vrot.lane.b32.xlu1 %v970_v22, %s1647_s19 }
0x1506   :  { %v973_v24 = vpop.permute.xlu1 %972 }
0x1507   :  { %v975_v31 = vadd.f32 %v973_v24, %v965_v23 }
0x1509   :  { %1642 = vtanh.f32 %v975_v31 }
0x1513   :  { %v1643_v25 = vpop.eup %1642 }
0x1514   :  { %978 = vrot.lane.b32.xlu0 %v1643_v25, %s1647_s19 }
0x1586   :  { %v979_v26 = vpop.permute.xlu0 %978 }
0x1587   :  { %v981_v27 = vmul.f32 %v1641_v19, %v979_v26 }
0x1589   :  { %994 = vrot.lane.b32.xlu1 %v981_v27, %s1648_s3 }
0x15fb   :  { %v995_v61 = vpop.permute.xlu1 %994 }
0x15fc   :  { %1497 = vmatmul.mubr.msk.f32.gmra.mrb[20].mxu0 %vm183_vm3, %v995_v61 }
0x16cf   :  { %v1498_v28 = vpop.f32.mrb[20].mxu0 }
0x16d0   :  { %v1100_v29 = vadd.f32 %v1498_v28, %v1899_v46  ;;  %v1094_v20 = vpop.f32.mrb[21].mxu0 }
0x16d1   :  { %v1095_v30 = vadd.f32 %v1899_v46, %v1094_v20 }
0x16d2   :  { %v1110_v33 = vmax.f32 %v1100_v29, 0.0 }
0x16d3   :  { %v1109_v32 = vmax.f32 %v1095_v30, 0.0 }
0x16d5   :  { %1512 = vmatprep.mubr.msk.f32.mxu1 %vm1120_vm4, %v1109_v32 }
0x16d6   :  { %1513 = vmatmul.mubr.msk.f32.gmra.mrb[16].mxu1 %vm1120_vm4, %v1110_v33 }
0x17a9   :  { %v1514_v34 = vpop.f32.mrb[16].mxu1 }
0x17aa   :  { %v1247_v35 = vadd.f32 %v1514_v34, %v1297_v4  ;;  %v1241_v60 = vpop.f32.mrb[17].mxu1 }
0x17ab   :  { %v1242_v36 = vadd.f32 %v1297_v4, %v1241_v60 }
0x17ac   :  { %1258 = vst.msk [vmem:[%s1970_s8 + $0x38] sm:$0xff] %vm1250_vm5, %v1247_v35 }
0x17ad   :  { %1257 = vst.msk [vmem:[%s1970_s8 + $0x30] sm:$0xff] %vm1250_vm5, %v1242_v36 }

</bundles_post_ra>
